<compile_context>
chip_gen: v5e
topology: v5e:2x2
jax: 0.10.0
libtpu: 0.0.40
codegen_flags: <defaults>
</compile_context>

<pallas_src>
from functools import partial

import jax
import jax.numpy as jnp
from jax.experimental import pallas as pl
from jax.experimental.pallas import tpu as pltpu


def mlp_kernel(x_ref, w1_ref, b1_ref, w2_ref, b2_ref, o_ref):
    # x arrives f32; cast to the MXU operand dtype (bf16 default, f32 optional).
    x = x_ref[...].astype(w1_ref.dtype)
    h = jnp.dot(x, w1_ref[...], preferred_element_type=jnp.float32) + b1_ref[...]
    h = jnp.maximum(h, 0.0)
    out = (
        jnp.dot(h.astype(w2_ref.dtype), w2_ref[...],
                preferred_element_type=jnp.float32)
        + b2_ref[...]
    )
    o_ref[...] = out.astype(o_ref.dtype)


def _round_up(n: int, m: int) -> int:
    return ((n + m - 1) // m) * m


def _pad2(a, rows, cols, dtype):
    """Zero-pad a 2-D array to (rows, cols) and cast; no-op pad if already sized."""
    r, c = a.shape
    if (r, c) == (rows, cols):
        return a.astype(dtype)
    out = jnp.zeros((rows, cols), a.dtype).at[:r, :c].set(a)
    return out.astype(dtype)


@partial(jax.jit, static_argnames=("compute_dtype", "tb_max"))
def mlp_forward(x, w1, b1, w2, b2, *, compute_dtype=jnp.bfloat16, tb_max=256):
    """y = relu(x @ w1 + b1) @ w2 + b2.

    x: (B, in_dim); w1: (in_dim, H); b1: (1, H); w2: (H, A); b2: (1, A).
    Returns float32 (B, A). Matmul operands run in `compute_dtype` (bf16 default),
    accumulation and biases stay f32 (mirrors input_x.float() in the torch module).
    """
    B, in_dim = x.shape
    H = w1.shape[1]
    A = w2.shape[1]

    x = x.astype(jnp.float32)  # torch module: input_x.float()

    # Lane-dense padding for hidden / output dims; x keeps its native lane extent
    # (block last dim == full array dim is always layout-legal).
    h_pad = _round_up(H, 128)
    a_pad = _round_up(A, 128)
    tb = min(_round_up(B, 16), tb_max)

    # Padding is value-safe: padded w1 columns give hidden = relu(0 + 0) = 0,
    # padded w2 rows/columns contribute 0, padded output lanes are sliced off.
    w1p = _pad2(w1, in_dim, h_pad, compute_dtype)
    b1p = _pad2(b1, 1, h_pad, jnp.float32)
    w2p = _pad2(w2, h_pad, a_pad, compute_dtype)
    b2p = _pad2(b2, 1, a_pad, jnp.float32)

    grid = (pl.cdiv(B, tb),)
    elem = jnp.dtype(compute_dtype).itemsize
    flops = 2 * B * in_dim * h_pad + 2 * B * h_pad * a_pad
    bytes_accessed = (
        B * in_dim * 4            # x (f32 stream)
        + in_dim * h_pad * elem   # w1
        + h_pad * a_pad * elem    # w2
        + (h_pad + a_pad) * 4     # biases (f32)
        + B * a_pad * 4           # output (f32)
    )

    out_padded = pl.pallas_call(
        mlp_kernel,
        out_shape=jax.ShapeDtypeStruct((B, a_pad), jnp.float32),
        grid_spec=pltpu.PrefetchScalarGridSpec(
            num_scalar_prefetch=0,
            grid=grid,
            in_specs=[
                pl.BlockSpec((tb, in_dim), lambda i: (i, 0)),     # x: streamed per batch tile
                pl.BlockSpec((in_dim, h_pad), lambda i: (0, 0)),  # w1: VMEM-resident
                pl.BlockSpec((1, h_pad), lambda i: (0, 0)),       # b1: VMEM-resident
                pl.BlockSpec((h_pad, a_pad), lambda i: (0, 0)),   # w2: VMEM-resident
                pl.BlockSpec((1, a_pad), lambda i: (0, 0)),       # b2: VMEM-resident
            ],
            out_specs=pl.BlockSpec((tb, a_pad), lambda i: (i, 0)),
        ),
        compiler_params=pltpu.CompilerParams(
            dimension_semantics=("parallel",),  # batch tiles independent -> megacore on v7x
        ),
        cost_estimate=pl.CostEstimate(
            flops=flops, transcendentals=0, bytes_accessed=bytes_accessed
        ),
    )(x, w1p, b1p, w2p, b2p)

    return out_padded[:, :A]


def init_params(key, input_dim, hidden_size, n_actions):
    """Deterministic init mimicking torch.nn.Linear default (uniform +-1/sqrt(fan_in))."""
    k1, k2, k3, k4 = jax.random.split(key, 4)
    bound1 = 1.0 / jnp.sqrt(input_dim)
    bound2 = 1.0 / jnp.sqrt(hidden_size)
    w1 = jax.random.uniform(k1, (input_dim, hidden_size), jnp.float32, -bound1, bound1)
    b1 = jax.random.uniform(k2, (1, hidden_size), jnp.float32, -bound1, bound1)
    w2 = jax.random.uniform(k3, (hidden_size, n_actions), jnp.float32, -bound2, bound2)
    b2 = jax.random.uniform(k4, (1, n_actions), jnp.float32, -bound2, bound2)
    return w1, b1, w2, b2


if __name__ == "__main__":
    key = jax.random.PRNGKey(0)
    batch, input_dim, hidden_size, n_actions = 2, 4, 128, 6  # module default hidden=128

    k_x, k_p = jax.random.split(key)
    x = jax.random.normal(k_x, (batch, input_dim), jnp.float32)
    w1, b1, w2, b2 = init_params(k_p, input_dim, hidden_size, n_actions)

    # Default (performance) path: bf16 MXU operands, f32 accumulation.
    out_bf16 = mlp_forward(x, w1, b1, w2, b2)
    # Exact path: f32 operands, matches the torch float32 module numerics.
    out_f32 = mlp_forward(x, w1, b1, w2, b2, compute_dtype=jnp.float32)
    jax.block_until_ready((out_bf16, out_f32))

    # Pure-JAX reference at highest matmul precision.
    hp = jax.lax.Precision.HIGHEST
    ref = jnp.dot(
        jnp.maximum(jnp.dot(x, w1, precision=hp) + b1, 0.0), w2, precision=hp
    ) + b2

    assert out_bf16.shape == (batch, n_actions)
    assert out_f32.shape == (batch, n_actions)
    assert jnp.allclose(out_f32, ref, atol=1e-3, rtol=1e-3), (
        f"f32 max abs err {jnp.max(jnp.abs(out_f32 - ref))}"
    )
    assert jnp.allclose(out_bf16, ref, atol=3e-2, rtol=3e-2), (
        f"bf16 max abs err {jnp.max(jnp.abs(out_bf16 - ref))}"
    )

    print("KERNEL_OK")
</pallas_src>

<mosaic_0001>
module attributes {stable_mosaic.version = 11 : i64} {
  func.func @mlp_kernel(%arg0: i32, %arg1: memref<16x4xf32, #tpu.memory_space<vmem>>, %arg2: memref<4x128xbf16, #tpu.memory_space<vmem>>, %arg3: memref<1x128xf32, #tpu.memory_space<vmem>>, %arg4: memref<128x128xbf16, #tpu.memory_space<vmem>>, %arg5: memref<1x128xf32, #tpu.memory_space<vmem>>, %arg6: memref<16x128xf32, #tpu.memory_space<vmem>>) attributes {dimension_semantics = [#tpu.dimension_semantics<parallel>], iteration_bounds = array<i64: 1>, scalar_prefetch = 0 : i64, scratch_operands = 0 : i64, tpu.core_type = #tpu.core_type<tc>, window_params = [{transform_indices = @transform_0, window_bounds = array<i64: 16, 4>}, {pipeline_mode = #tpu.pipeline_mode<synchronous>, transform_indices = @transform_1, window_bounds = array<i64: 4, 128>}, {pipeline_mode = #tpu.pipeline_mode<synchronous>, transform_indices = @transform_2, window_bounds = array<i64: 1, 128>}, {pipeline_mode = #tpu.pipeline_mode<synchronous>, transform_indices = @transform_3, window_bounds = array<i64: 128, 128>}, {pipeline_mode = #tpu.pipeline_mode<synchronous>, transform_indices = @transform_4, window_bounds = array<i64: 1, 128>}, {transform_indices = @transform_5, window_bounds = array<i64: 16, 128>}]} {
    %c0 = arith.constant 0 : index
    %c0_0 = arith.constant 0 : index
    %0 = vector.load %arg1[%c0, %c0_0] : memref<16x4xf32, #tpu.memory_space<vmem>>, vector<16x4xf32>
    %1 = arith.truncf %0 : vector<16x4xf32> to vector<16x4xbf16>
    %c0_1 = arith.constant 0 : index
    %c0_2 = arith.constant 0 : index
    %2 = vector.load %arg2[%c0_1, %c0_2] : memref<4x128xbf16, #tpu.memory_space<vmem>>, vector<4x128xbf16>
    %cst = arith.constant dense<0.000000e+00> : vector<16x128xf32>
    %3 = tpu.matmul %1, %2, %cst {dimension_numbers = #tpu.dot_dimension_numbers<[1], [0], [0], [1], [0, 0, 1, 1], [], []>} : vector<16x4xbf16>, vector<4x128xbf16>, vector<16x128xf32> -> vector<16x128xf32>
    %c0_3 = arith.constant 0 : index
    %c0_4 = arith.constant 0 : index
    %4 = vector.load %arg3[%c0_3, %c0_4] : memref<1x128xf32, #tpu.memory_space<vmem>>, vector<1x128xf32>
    %5 = vector.broadcast %4 : vector<1x128xf32> to vector<16x128xf32>
    %6 = arith.addf %3, %5 : vector<16x128xf32>
    %cst_5 = arith.constant 0.000000e+00 : f32
    %7 = vector.broadcast %cst_5 : f32 to vector<16x128xf32>
    %8 = arith.maximumf %6, %7 : vector<16x128xf32>
    %9 = arith.truncf %8 : vector<16x128xf32> to vector<16x128xbf16>
    %c0_6 = arith.constant 0 : index
    %c0_7 = arith.constant 0 : index
    %10 = vector.load %arg4[%c0_6, %c0_7] : memref<128x128xbf16, #tpu.memory_space<vmem>>, vector<128x128xbf16>
    %cst_8 = arith.constant dense<0.000000e+00> : vector<16x128xf32>
    %11 = tpu.matmul %9, %10, %cst_8 {dimension_numbers = #tpu.dot_dimension_numbers<[1], [0], [0], [1], [0, 0, 1, 1], [], []>} : vector<16x128xbf16>, vector<128x128xbf16>, vector<16x128xf32> -> vector<16x128xf32>
    %c0_9 = arith.constant 0 : index
    %c0_10 = arith.constant 0 : index
    %12 = vector.load %arg5[%c0_9, %c0_10] : memref<1x128xf32, #tpu.memory_space<vmem>>, vector<1x128xf32>
    %13 = vector.broadcast %12 : vector<1x128xf32> to vector<16x128xf32>
    %14 = arith.addf %11, %13 : vector<16x128xf32>
    %c0_11 = arith.constant 0 : index
    %c0_12 = arith.constant 0 : index
    %15 = vector.load %arg6[%c0_11, %c0_12] : memref<16x128xf32, #tpu.memory_space<vmem>>, vector<16x128xf32>
    tpu.vector_store %arg6[%c0_11, %c0_12], %14 {strides = array<i32>} : memref<16x128xf32, #tpu.memory_space<vmem>>, vector<16x128xf32>,
    return
  }
  func.func @transform_0(%arg0: i32) -> (i32, i32) {
    %c0_i32 = arith.constant 0 : i32
    %c0_i32_0 = arith.constant 0 : i32
    return %arg0, %c0_i32 : i32, i32
  }
  func.func @transform_1(%arg0: i32) -> (i32, i32) {
    %c0_i32 = arith.constant 0 : i32
    %c0_i32_0 = arith.constant 0 : i32
    %c0_i32_1 = arith.constant 0 : i32
    return %c0_i32, %c0_i32_0 : i32, i32
  }
  func.func @transform_2(%arg0: i32) -> (i32, i32) {
    %c0_i32 = arith.constant 0 : i32
    %c0_i32_0 = arith.constant 0 : i32
    %c0_i32_1 = arith.constant 0 : i32
    return %c0_i32, %c0_i32_0 : i32, i32
  }
  func.func @transform_3(%arg0: i32) -> (i32, i32) {
    %c0_i32 = arith.constant 0 : i32
    %c0_i32_0 = arith.constant 0 : i32
    %c0_i32_1 = arith.constant 0 : i32
    return %c0_i32, %c0_i32_0 : i32, i32
  }
  func.func @transform_4(%arg0: i32) -> (i32, i32) {
    %c0_i32 = arith.constant 0 : i32
    %c0_i32_0 = arith.constant 0 : i32
    %c0_i32_1 = arith.constant 0 : i32
    return %c0_i32, %c0_i32_0 : i32, i32
  }
  func.func @transform_5(%arg0: i32) -> (i32, i32) {
    %c0_i32 = arith.constant 0 : i32
    %c0_i32_0 = arith.constant 0 : i32
    return %arg0, %c0_i32 : i32, i32
  }
}

</mosaic_0001>

<bundles_post_ra>
// kernel: mlp_forward.1
= control target key start
LH: loop header
LB: loop body
LE: loop exit
PB: predicated region body
PF: predicated region fallthrough
CT: control target
= control target key end

     0   :  { %10 = vsyncpa [#allocation3], 0  ;;  %vm34_vm0 = vcmask 1041408   ;;  %vm30_vm1 = vcmask 31744   ;;  %s304_s0 = inlined_call_operand.vmem [shape: f32[2,4], index: 0, kind: input, shape index: {}]   ;;  %s305_s1 = inlined_call_operand.vmem [shape: bf16[4,128], index: 1, kind: input, shape index: {}]   ;;  %s306_s2 = inlined_call_operand.vmem [shape: f32[1,128], index: 2, kind: input, shape index: {}]   ;;  %s307_s3 = inlined_call_operand.vmem [shape: bf16[128,128], index: 3, kind: input, shape index: {}]   ;;  %s308_s4 = inlined_call_operand.vmem [shape: f32[1,128], index: 4, kind: input, shape index: {}]   ;;  %s309_s5 = inlined_call_operand.hbm [shape: f32[2,128], index: 5, kind: output, shape index: {}]  }
   0x1   :  { %v25_v0 = vld [vmem:[%s305_s1] sm:$0x3]  ;;  %v23_v3 = vld [vmem:[%s304_s0 + $0x8] sm:$0xff]  ;;  %v197_v4 = vld [vmem:[%s307_s3 + $0x38] sm:$0xff] }
   0x2   :  { %v22_v1 = vld [vmem:[%s304_s0] sm:$0xff]  ;;  %v36_v2 = vsel %vm34_vm0, %v25_v0, 0  ;;  %123 = vmatpush.bf16.msra.mxu1 %v197_v4  ;;  %v196_v6 = vld [vmem:[%s307_s3 + $0x30] sm:$0xff]  ;;  %v195_v7 = vld [vmem:[%s307_s3 + $0x28] sm:$0xff] }
   0x3   :  { %45 = vmatpush.bf16.msra.mxu0 %v36_v2  ;;  %v24_v5 = vpack.c.bf16 %v23_v3, %v22_v1  ;;  %v194_v8 = vld [vmem:[%s307_s3 + $0x20] sm:$0xff]  ;;  %v193_v9 = vld [vmem:[%s307_s3 + $0x18] sm:$0xff]  ;;  %v192_v10 = vld [vmem:[%s307_s3 + $0x10] sm:$0xff] }
   0x4   :  { %v191_v11 = vld [vmem:[%s307_s3 + $0x8] sm:$0xff]  ;;  %v190_v12 = vld [vmem:[%s307_s3] sm:$0xff] }
   0x5   :  { %v201_v14 = vld [vmem:[%s306_s2] ss:$0 sm:$0xff] }
   0x6   :  { %157 = vmatmul.msk.bf16.vlgmr.msra.gmra.mxu0 %vm30_vm1, %v24_v5  ;;  %124 = vmatpush.bf16.msra.mxu1 %v196_v6  ;;  %v202_v21 = vld [vmem:[%s308_s4] ss:$0 sm:$0xff] }
   0xa   :  { %125 = vmatpush.bf16.msra.mxu1 %v195_v7 }
   0xe   :  { %126 = vmatpush.bf16.msra.mxu1 %v194_v8 }
  0x12   :  { %127 = vmatpush.bf16.msra.mxu1 %v193_v9 }
  0x16   :  { %128 = vmatpush.bf16.msra.mxu1 %v192_v10 }
  0x1a   :  { %129 = vmatpush.bf16.msra.mxu1 %v191_v11 }
  0x1e   :  { %130 = vmatpush.bf16.msra.mxu1 %v190_v12 }
  0x83   :  { %v47_v13 = vpop.f32.mrf.mxu0 }
  0x84   :  { %v48_v15 = vadd.f32 %v201_v14, %v47_v13 }
  0x86   :  { %v52_v18 = vmax.f32 %v48_v15, 0.0 }
  0x8b   :  { %v49_v16 = vpop.f32.mrf.mxu0 }
  0x8c   :  { %v50_v17 = vadd.f32 %v201_v14, %v49_v16 }
  0x8e   :  { %v53_v19 = vmax.f32 %v50_v17, 0.0 }
  0x90   :  { %v54_v20 = vpack.c.bf16 %v53_v19, %v52_v18 }
  0x92   :  { %131 = vmatmul.bf16.vlgmr.msra.gmra.mxu1 %v54_v20 }
 0x10f   :  { %v132_v22 = vpop.f32.mrf.mxu1 }
 0x110   :  { %v133_v23 = vadd.f32 %v202_v21, %v132_v22 }
 0x112   :  { %137 = vst [vmem:[#allocation2] sm:$0xff] %v133_v23 }
 0x117   :  { %v134_v24 = vpop.f32.mrf.mxu1 }
 0x118   :  { %v135_v25 = vadd.f32 %v202_v21, %v134_v24 }
 0x11a   :  { %138 = vst [vmem:[#allocation2 + $0x8] sm:$0xff] %v135_v25 }
 0x11b   :  { %142 = vsyncadd [#allocation3], 224  ;;  %s145_s17 = sshll.u32 %s309_s5, 4  ;;  %s229_s18 = smov [#allocation2]   ;;  %s146_s17 = int_to_ptr.hbm [resolvable:$true] %s145_s17 }
 0x11c   :  { %s143_s19 = sshll.u32 %s229_s18, 4  ;;  %s230_s20 = smov 32   ;;  %s144_s19 = int_to_ptr.vmem [resolvable:$true] %s143_s19 }
 0x11d   :  { %s231_s21 = smov 2  }
 0x11e   :  { %151 = dma.vmem_to_hbm [thread:$0]  %s144_s19, 32, %s146_s17, [#allocation3], %s230_s20, %s230_s20, %s231_s21  }
 0x11f   :  { %227 = dma.done.wait [#allocation3], 256  }
 0x120   :  { %228 = vsyncadd [#allocation3], 4294967040 }
 0x121   :  { %156 = vsyncpa [#allocation3], 1 }

</bundles_post_ra>
